<compile_context>
chip_gen: v5e
topology: v5e:2x2
jax: 0.10.0
libtpu: 0.0.40
codegen_flags: <defaults>
</compile_context>

<pallas_src>
import functools
import math

import jax
import jax.numpy as jnp
from jax.experimental import pallas as pl
from jax.experimental.pallas import tpu as pltpu

LN_EPS = 1e-5
_INV_SQRT2 = 1.0 / math.sqrt(2.0)
MXU_DTYPE = jnp.bfloat16                  # matmul operand dtype (f32 accumulation)


def _round_up(x, m):
    return ((x + m - 1) // m) * m


def _vmem_budget_bytes():
    """Generation-aware usable-VMEM budget (headroom left for pipeliner internals)."""
    try:
        cap = int(pltpu.get_tpu_info().vmem_capacity_bytes)
    except Exception:
        cap = 64 * 1024 * 1024
    # ~104 MiB on 128 MiB chips (v5e/v6e), ~40 MiB on 64 MiB-per-TC chips (v7x).
    return max(32 * 1024 * 1024, cap - 24 * 1024 * 1024)


def _gelu_compute_dtype():
    """bf16 GELU on chips with a bf16 VPU (v6e/v7x); f32 on v5e and older."""
    try:
        kind = jax.devices()[0].device_kind.lower()
    except Exception:
        return jnp.float32
    if any(tag in kind for tag in ("v2", "v3", "v4", "v5")):
        return jnp.float32
    return jnp.bfloat16


def _layernorm_f32(x_ref, g_ref, beta_ref):
    """LayerNorm with biased variance, eps=1e-5 (PyTorch semantics), f32 math."""
    x = x_ref[...].astype(jnp.float32)
    mean = jnp.mean(x, axis=-1, keepdims=True)
    c = x - mean
    var = jnp.mean(c * c, axis=-1, keepdims=True)
    xn = c * jax.lax.rsqrt(var + LN_EPS)
    return xn * g_ref[...].astype(jnp.float32) + beta_ref[...].astype(jnp.float32)


def _gelu_erf(h_f32, b1_ref, dtype):
    """Exact (erf-form) GELU with bias add, computed in `dtype` (f32 or bf16)."""
    h = h_f32.astype(dtype) + b1_ref[...].astype(dtype)
    return 0.5 * h * (1.0 + jax.lax.erf(h * _INV_SQRT2))


# --------------------------------------------------------------------------- #
# Kernels
# --------------------------------------------------------------------------- #
def _ffn_kernel_resident(x_ref, g_ref, beta_ref, w1_ref, b1_ref, w2_ref, b2_ref,
                         o_ref, *, gelu_dtype):
    """Full weights resident in VMEM; single (row-tile) grid axis."""
    xn = _layernorm_f32(x_ref, g_ref, beta_ref)
    h = jnp.dot(xn.astype(w1_ref.dtype), w1_ref[...],
                preferred_element_type=jnp.float32)
    h = _gelu_erf(h, b1_ref, gelu_dtype)
    y = jnp.dot(h.astype(w2_ref.dtype), w2_ref[...],
                preferred_element_type=jnp.float32)
    y = y + b2_ref[...].astype(jnp.float32)
    o_ref[...] = y.astype(o_ref.dtype)


def _ffn_kernel_tiled(x_ref, g_ref, beta_ref, w1_ref, b1_ref, w2_ref, b2_ref,
                      o_ref, xn_ref, acc_ref, *, gelu_dtype):
    """Inner dim H tiled on the last ("arbitrary") grid axis; f32 accumulator."""
    k = pl.program_id(1)

    @pl.when(k == 0)
    def _():
        xn_ref[...] = _layernorm_f32(x_ref, g_ref, beta_ref).astype(xn_ref.dtype)
        acc_ref[...] = jnp.zeros_like(acc_ref)

    h = jnp.dot(xn_ref[...], w1_ref[...], preferred_element_type=jnp.float32)
    h = _gelu_erf(h, b1_ref, gelu_dtype)
    acc_ref[...] += jnp.dot(h.astype(w2_ref.dtype), w2_ref[...],
                            preferred_element_type=jnp.float32)

    @pl.when(k == pl.num_programs(1) - 1)
    def _():
        # TODO(synk): for f32 outputs, accumulate directly into o_ref and drop acc_ref.
        y = acc_ref[...] + b2_ref[...].astype(jnp.float32)
        o_ref[...] = y.astype(o_ref.dtype)


# --------------------------------------------------------------------------- #
# Tile-size heuristics
# --------------------------------------------------------------------------- #
def _pick_block_m_resident(N, D, H, budget, bm_max=1024):
    bm = min(bm_max, _round_up(N, 8))
    weights = 4 * D * H  # bf16 w1 + w2, single-buffered

    def est(m):
        return (weights
                + 2 * m * D * 4     # x tile, double-buffered (f32 worst case)
                + 2 * m * D * 4     # out tile, double-buffered
                + m * H * 6         # f32 h + bf16 copy (live intermediates)
                + m * D * 8)        # f32 xn & misc temporaries

    while bm > 8 and est(bm) > budget:
        bm = max(8, bm // 2)
    return bm


def _pick_block_h(H, target=512):
    """256-aligned divisor of H near `target` (>=512 keeps w1 DMA runs >=1 KiB)."""
    if H <= target:
        return H
    for bh in range(target, 255, -256):
        if H % bh == 0:
            return bh
    for bh in range(target, 127, -128):
        if H % bh == 0:
            return bh
    return H


def _pick_block_m_tiled(N, D, H, bh, budget, bm_max=1024):
    bm = min(bm_max, _round_up(N, 8))

    def est(m):
        return (2 * m * D * 4          # x tiles (double-buffered, f32 worst case)
                + 2 * m * D * 4        # out tiles
                + m * D * 2            # bf16 LN-output scratch
                + m * D * 4            # f32 accumulator scratch
                + m * bh * 6           # h intermediate (f32 + bf16 copy)
                + 2 * 2 * D * bh * 2)  # w1/w2 bf16 slices, double-buffered

    while bm > 8 and est(bm) > budget:
        bm = max(8, bm // 2)
    return bm


# --------------------------------------------------------------------------- #
# pallas_call wrappers
# --------------------------------------------------------------------------- #
def _call_resident(xf, g2, be2, w1c, b1_2, w2c, b2_2, *, block_m, gelu_dtype, budget):
    N, D = xf.shape
    H = w1c.shape[1]
    grid = (pl.cdiv(N, block_m),)

    cost = pl.CostEstimate(
        flops=4 * N * D * H,
        transcendentals=N * H,
        bytes_accessed=2 * N * D * xf.dtype.itemsize + 4 * D * H,
    )

    def run(single_buffer_consts):
        def const_spec(shape):
            # Constant block index across the whole grid -> fetched exactly once.
            # Buffered(1) drops the never-used second buffer (halves weight VMEM).
            if single_buffer_consts:
                return pl.BlockSpec(shape, lambda i: (0, 0),
                                    pipeline_mode=pl.Buffered(1))
            return pl.BlockSpec(shape, lambda i: (0, 0))

        return pl.pallas_call(
            functools.partial(_ffn_kernel_resident, gelu_dtype=gelu_dtype),
            out_shape=jax.ShapeDtypeStruct((N, D), xf.dtype),
            grid_spec=pltpu.PrefetchScalarGridSpec(
                num_scalar_prefetch=0,
                grid=grid,
                in_specs=[
                    pl.BlockSpec((block_m, D), lambda i: (i, 0)),   # x row tile
                    const_spec((1, D)),                             # gamma
                    const_spec((1, D)),                             # beta
                    const_spec((D, H)),                             # w1 (resident)
                    const_spec((1, H)),                             # b1
                    const_spec((H, D)),                             # w2 (resident)
                    const_spec((1, D)),                             # b2
                ],
                out_specs=pl.BlockSpec((block_m, D), lambda i: (i, 0)),
            ),
            compiler_params=pltpu.CompilerParams(
                dimension_semantics=("parallel",),   # shards rows across TCs on v7x
                vmem_limit_bytes=budget,
            ),
            cost_estimate=cost,
        )(xf, g2, be2, w1c, b1_2, w2c, b2_2)

    try:
        return run(True)
    except Exception:
        # Fallback for JAX versions without BlockSpec(pipeline_mode=...).
        return run(False)


def _call_tiled(xf, g2, be2, w1c, b1_2, w2c, b2_2, *, block_m, block_h,
                gelu_dtype, budget):
    N, D = xf.shape
    H = w1c.shape[1]
    n_row_tiles = pl.cdiv(N, block_m)
    grid = (n_row_tiles, H // block_h)

    cost = pl.CostEstimate(
        flops=4 * N * D * H,
        transcendentals=N * H,
        bytes_accessed=2 * N * D * xf.dtype.itemsize + n_row_tiles * 4 * D * H,
    )

    return pl.pallas_call(
        functools.partial(_ffn_kernel_tiled, gelu_dtype=gelu_dtype),
        out_shape=jax.ShapeDtypeStruct((N, D), xf.dtype),
        grid_spec=pltpu.PrefetchScalarGridSpec(
            num_scalar_prefetch=0,
            grid=grid,
            in_specs=[
                pl.BlockSpec((block_m, D), lambda i, k: (i, 0)),     # x rows
                pl.BlockSpec((1, D), lambda i, k: (0, 0)),           # gamma
                pl.BlockSpec((1, D), lambda i, k: (0, 0)),           # beta
                pl.BlockSpec((D, block_h), lambda i, k: (0, k)),     # w1 H-slice
                pl.BlockSpec((1, block_h), lambda i, k: (0, k)),     # b1 H-slice
                pl.BlockSpec((block_h, D), lambda i, k: (k, 0)),     # w2 H-slice
                pl.BlockSpec((1, D), lambda i, k: (0, 0)),           # b2
            ],
            out_specs=pl.BlockSpec((block_m, D), lambda i, k: (i, 0)),
            scratch_shapes=[
                pltpu.VMEM((block_m, D), MXU_DTYPE),     # cached LN output
                pltpu.VMEM((block_m, D), jnp.float32),   # f32 output accumulator
            ],
        ),
        compiler_params=pltpu.CompilerParams(
            dimension_semantics=("parallel", "arbitrary"),
            vmem_limit_bytes=budget,
        ),
        cost_estimate=cost,
    )(xf, g2, be2, w1c, b1_2, w2c, b2_2)


def ffn_forward(x, gamma, beta, w1, b1, w2, b2, *, block_m=None, block_h=None):
    """FFN forward: LayerNorm -> Linear(D,H) -> GELU -> Linear(H,D).

    x: [batch, seq, dim]; wi are [in, out] (transposed vs PyTorch); gamma/beta/b2
    are [dim]; b1 is [H].  Weights may be pre-cast to bf16 by the caller.
    """
    B, S, D = x.shape
    H = w1.shape[1]
    N = B * S
    xf = x.reshape(N, D)

    budget = _vmem_budget_bytes()
    gelu_dtype = _gelu_compute_dtype()

    # bf16 MXU operands — no-op if the caller already stores bf16 weights.
    w1c = w1 if w1.dtype == MXU_DTYPE else w1.astype(MXU_DTYPE)
    w2c = w2 if w2.dtype == MXU_DTYPE else w2.astype(MXU_DTYPE)

    # 2-D, lane-major views of the per-feature params (broadcastable rows).
    g2 = gamma.reshape(1, D).astype(jnp.float32)
    be2 = beta.reshape(1, D).astype(jnp.float32)
    b1_2 = b1.reshape(1, H).astype(jnp.float32)
    b2_2 = b2.reshape(1, D).astype(jnp.float32)

    weight_bytes = 4 * D * H  # both bf16 weight matrices, single-buffered
    use_resident = (block_h is None or block_h == H) and weight_bytes <= budget // 2

    if use_resident:
        bm = block_m if block_m is not None else _pick_block_m_resident(N, D, H, budget)
        out = _call_resident(xf, g2, be2, w1c, b1_2, w2c, b2_2,
                             block_m=bm, gelu_dtype=gelu_dtype, budget=budget)
    else:
        bh = block_h if block_h is not None else _pick_block_h(H)
        if H % bh != 0:
            raise ValueError(f"block_h ({bh}) must divide inner dim ({H})")
        bm = block_m if block_m is not None else _pick_block_m_tiled(N, D, H, bh, budget)
        out = _call_tiled(xf, g2, be2, w1c, b1_2, w2c, b2_2,
                          block_m=bm, block_h=bh, gelu_dtype=gelu_dtype, budget=budget)

    return out.reshape(B, S, D)


# --------------------------------------------------------------------------- #
# Parameter init & pure-JAX reference
# --------------------------------------------------------------------------- #
def init_ffn_params(key, dim, mult=4, dtype=jnp.float32):
    inner_dim = int(dim * mult)
    k1, k2, k3, k4 = jax.random.split(key, 4)
    # PyTorch nn.Linear default init: U(-1/sqrt(fan_in), 1/sqrt(fan_in))
    lim1 = 1.0 / math.sqrt(dim)
    lim2 = 1.0 / math.sqrt(inner_dim)
    w1 = jax.random.uniform(k1, (dim, inner_dim), dtype, -lim1, lim1)
    b1 = jax.random.uniform(k2, (inner_dim,), dtype, -lim1, lim1)
    w2 = jax.random.uniform(k3, (inner_dim, dim), dtype, -lim2, lim2)
    b2 = jax.random.uniform(k4, (dim,), dtype, -lim2, lim2)
    gamma = jnp.ones((dim,), dtype)   # LayerNorm weight init
    beta = jnp.zeros((dim,), dtype)   # LayerNorm bias init
    return gamma, beta, w1, b1, w2, b2


def ffn_reference(x, gamma, beta, w1, b1, w2, b2):
    """Pure-JAX f32 reference for correctness checking."""
    mean = jnp.mean(x, axis=-1, keepdims=True)
    var = jnp.mean((x - mean) ** 2, axis=-1, keepdims=True)
    xn = (x - mean) / jnp.sqrt(var + LN_EPS) * gamma + beta
    h = xn @ w1 + b1
    h = 0.5 * h * (1.0 + jax.lax.erf(h * _INV_SQRT2))
    return h @ w2 + b2


if __name__ == "__main__":
    batch, seq, dim = 2, 8, 32          # inner_dim = 128
    key = jax.random.PRNGKey(0)
    kx, kp = jax.random.split(key)
    x = jax.random.normal(kx, (batch, seq, dim), jnp.float32)
    gamma, beta, w1, b1, w2, b2 = init_ffn_params(kp, dim, mult=4)

    # Store matmul weights in bf16 once (no per-call f32->bf16 HBM pass).
    w1c = w1.astype(MXU_DTYPE)
    w2c = w2.astype(MXU_DTYPE)

    out = ffn_forward(x, gamma, beta, w1c, b1, w2c, b2)
    out = jax.block_until_ready(out)

    # Reference uses the same (bf16-rounded) weights in f32 math, so only the
    # kernel's bf16 MXU / GELU compute precision differs.
    ref = ffn_reference(x, gamma, beta, w1c.astype(jnp.float32), b1,
                        w2c.astype(jnp.float32), b2)
    assert out.shape == (batch, seq, dim)
    assert jnp.allclose(out, ref, atol=3e-2, rtol=3e-2), "mismatch vs reference"
    print("KERNEL_OK")
</pallas_src>

<mosaic_0001>
module attributes {stable_mosaic.version = 11 : i64} {
  func.func @_ffn_kernel_resident(%arg0: i32, %arg1: memref<16x32xf32, #tpu.memory_space<vmem>>, %arg2: memref<1x32xf32, #tpu.memory_space<vmem>>, %arg3: memref<1x32xf32, #tpu.memory_space<vmem>>, %arg4: memref<32x128xbf16, #tpu.memory_space<vmem>>, %arg5: memref<1x128xf32, #tpu.memory_space<vmem>>, %arg6: memref<128x32xbf16, #tpu.memory_space<vmem>>, %arg7: memref<1x32xf32, #tpu.memory_space<vmem>>, %arg8: memref<16x32xf32, #tpu.memory_space<vmem>>) attributes {dimension_semantics = [#tpu.dimension_semantics<parallel>], iteration_bounds = array<i64: 1>, scalar_prefetch = 0 : i64, scratch_operands = 0 : i64, tpu.core_type = #tpu.core_type<tc>, window_params = [{transform_indices = @transform_0, window_bounds = array<i64: 16, 32>}, {pipeline_mode = #tpu.pipeline_mode<synchronous>, transform_indices = @transform_1, window_bounds = array<i64: 1, 32>}, {pipeline_mode = #tpu.pipeline_mode<synchronous>, transform_indices = @transform_2, window_bounds = array<i64: 1, 32>}, {pipeline_mode = #tpu.pipeline_mode<synchronous>, transform_indices = @transform_3, window_bounds = array<i64: 32, 128>}, {pipeline_mode = #tpu.pipeline_mode<synchronous>, transform_indices = @transform_4, window_bounds = array<i64: 1, 128>}, {pipeline_mode = #tpu.pipeline_mode<synchronous>, transform_indices = @transform_5, window_bounds = array<i64: 128, 32>}, {pipeline_mode = #tpu.pipeline_mode<synchronous>, transform_indices = @transform_6, window_bounds = array<i64: 1, 32>}, {transform_indices = @transform_7, window_bounds = array<i64: 16, 32>}]} {
    %c0 = arith.constant 0 : index
    %c0_0 = arith.constant 0 : index
    %0 = vector.load %arg1[%c0, %c0_0] : memref<16x32xf32, #tpu.memory_space<vmem>>, vector<16x32xf32>
    %cst = arith.constant dense<0.000000e+00> : vector<16xf32>
    %1 = vector.multi_reduction <add>, %0, %cst [1] : vector<16x32xf32> to vector<16xf32>
    %2 = vector.shape_cast %1 : vector<16xf32> to vector<16x1xf32>
    %cst_1 = arith.constant 3.200000e+01 : f32
    %3 = vector.broadcast %cst_1 : f32 to vector<16x1xf32>
    %4 = arith.divf %2, %3 : vector<16x1xf32>
    %5 = vector.broadcast %4 : vector<16x1xf32> to vector<16x32xf32>
    %6 = arith.subf %0, %5 : vector<16x32xf32>
    %7 = arith.mulf %6, %6 : vector<16x32xf32>
    %cst_2 = arith.constant dense<0.000000e+00> : vector<16xf32>
    %8 = vector.multi_reduction <add>, %7, %cst_2 [1] : vector<16x32xf32> to vector<16xf32>
    %9 = vector.shape_cast %8 : vector<16xf32> to vector<16x1xf32>
    %cst_3 = arith.constant 3.200000e+01 : f32
    %10 = vector.broadcast %cst_3 : f32 to vector<16x1xf32>
    %11 = arith.divf %9, %10 : vector<16x1xf32>
    %cst_4 = arith.constant 9.99999974E-6 : f32
    %12 = vector.broadcast %cst_4 : f32 to vector<16x1xf32>
    %13 = arith.addf %11, %12 : vector<16x1xf32>
    %14 = math.rsqrt %13 : vector<16x1xf32>
    %15 = vector.broadcast %14 : vector<16x1xf32> to vector<16x32xf32>
    %16 = arith.mulf %6, %15 : vector<16x32xf32>
    %c0_5 = arith.constant 0 : index
    %c0_6 = arith.constant 0 : index
    %17 = vector.load %arg2[%c0_5, %c0_6] : memref<1x32xf32, #tpu.memory_space<vmem>>, vector<1x32xf32>
    %18 = vector.broadcast %17 : vector<1x32xf32> to vector<16x32xf32>
    %19 = arith.mulf %16, %18 : vector<16x32xf32>
    %c0_7 = arith.constant 0 : index
    %c0_8 = arith.constant 0 : index
    %20 = vector.load %arg3[%c0_7, %c0_8] : memref<1x32xf32, #tpu.memory_space<vmem>>, vector<1x32xf32>
    %21 = vector.broadcast %20 : vector<1x32xf32> to vector<16x32xf32>
    %22 = arith.addf %19, %21 : vector<16x32xf32>
    %23 = arith.truncf %22 : vector<16x32xf32> to vector<16x32xbf16>
    %c0_9 = arith.constant 0 : index
    %c0_10 = arith.constant 0 : index
    %24 = vector.load %arg4[%c0_9, %c0_10] : memref<32x128xbf16, #tpu.memory_space<vmem>>, vector<32x128xbf16>
    %cst_11 = arith.constant dense<0.000000e+00> : vector<16x128xf32>
    %25 = tpu.matmul %23, %24, %cst_11 {dimension_numbers = #tpu.dot_dimension_numbers<[1], [0], [0], [1], [0, 0, 1, 1], [], []>} : vector<16x32xbf16>, vector<32x128xbf16>, vector<16x128xf32> -> vector<16x128xf32>
    %26 = arith.truncf %25 : vector<16x128xf32> to vector<16x128xbf16>
    %c0_12 = arith.constant 0 : index
    %c0_13 = arith.constant 0 : index
    %27 = vector.load %arg5[%c0_12, %c0_13] : memref<1x128xf32, #tpu.memory_space<vmem>>, vector<1x128xf32>
    %28 = arith.truncf %27 : vector<1x128xf32> to vector<1x128xbf16>
    %29 = vector.broadcast %28 : vector<1x128xbf16> to vector<16x128xbf16>
    %30 = arith.addf %26, %29 : vector<16x128xbf16>
    %cst_14 = arith.constant 5.000000e-01 : bf16
    %31 = vector.broadcast %cst_14 : bf16 to vector<16x128xbf16>
    %32 = arith.mulf %31, %30 : vector<16x128xbf16>
    %cst_15 = arith.constant 7.070310e-01 : bf16
    %33 = vector.broadcast %cst_15 : bf16 to vector<16x128xbf16>
    %34 = arith.mulf %30, %33 : vector<16x128xbf16>
    %35 = math.erf %34 : vector<16x128xbf16>
    %cst_16 = arith.constant 1.000000e+00 : bf16
    %36 = vector.broadcast %cst_16 : bf16 to vector<16x128xbf16>
    %37 = arith.addf %36, %35 : vector<16x128xbf16>
    %38 = arith.mulf %32, %37 : vector<16x128xbf16>
    %c0_17 = arith.constant 0 : index
    %c0_18 = arith.constant 0 : index
    %39 = vector.load %arg6[%c0_17, %c0_18] : memref<128x32xbf16, #tpu.memory_space<vmem>>, vector<128x32xbf16>
    %cst_19 = arith.constant dense<0.000000e+00> : vector<16x32xf32>
    %40 = tpu.matmul %38, %39, %cst_19 {dimension_numbers = #tpu.dot_dimension_numbers<[1], [0], [0], [1], [0, 0, 1, 1], [], []>} : vector<16x128xbf16>, vector<128x32xbf16>, vector<16x32xf32> -> vector<16x32xf32>
    %c0_20 = arith.constant 0 : index
    %c0_21 = arith.constant 0 : index
    %41 = vector.load %arg7[%c0_20, %c0_21] : memref<1x32xf32, #tpu.memory_space<vmem>>, vector<1x32xf32>
    %42 = vector.broadcast %41 : vector<1x32xf32> to vector<16x32xf32>
    %43 = arith.addf %40, %42 : vector<16x32xf32>
    %c0_22 = arith.constant 0 : index
    %c0_23 = arith.constant 0 : index
    %44 = vector.load %arg8[%c0_22, %c0_23] : memref<16x32xf32, #tpu.memory_space<vmem>>, vector<16x32xf32>
    tpu.vector_store %arg8[%c0_22, %c0_23], %43 {strides = array<i32>} : memref<16x32xf32, #tpu.memory_space<vmem>>, vector<16x32xf32>,
    return
  }
  func.func @transform_0(%arg0: i32) -> (i32, i32) {
    %c0_i32 = arith.constant 0 : i32
    %c0_i32_0 = arith.constant 0 : i32
    return %arg0, %c0_i32 : i32, i32
  }
  func.func @transform_1(%arg0: i32) -> (i32, i32) {
    %c0_i32 = arith.constant 0 : i32
    %c0_i32_0 = arith.constant 0 : i32
    %c0_i32_1 = arith.constant 0 : i32
    return %c0_i32, %c0_i32_0 : i32, i32
  }
  func.func @transform_2(%arg0: i32) -> (i32, i32) {
    %c0_i32 = arith.constant 0 : i32
    %c0_i32_0 = arith.constant 0 : i32
    %c0_i32_1 = arith.constant 0 : i32
    return %c0_i32, %c0_i32_0 : i32, i32
  }
  func.func @transform_3(%arg0: i32) -> (i32, i32) {
    %c0_i32 = arith.constant 0 : i32
    %c0_i32_0 = arith.constant 0 : i32
    %c0_i32_1 = arith.constant 0 : i32
    return %c0_i32, %c0_i32_0 : i32, i32
  }
  func.func @transform_4(%arg0: i32) -> (i32, i32) {
    %c0_i32 = arith.constant 0 : i32
    %c0_i32_0 = arith.constant 0 : i32
    %c0_i32_1 = arith.constant 0 : i32
    return %c0_i32, %c0_i32_0 : i32, i32
  }
  func.func @transform_5(%arg0: i32) -> (i32, i32) {
    %c0_i32 = arith.constant 0 : i32
    %c0_i32_0 = arith.constant 0 : i32
    %c0_i32_1 = arith.constant 0 : i32
    return %c0_i32, %c0_i32_0 : i32, i32
  }
  func.func @transform_6(%arg0: i32) -> (i32, i32) {
    %c0_i32 = arith.constant 0 : i32
    %c0_i32_0 = arith.constant 0 : i32
    %c0_i32_1 = arith.constant 0 : i32
    return %c0_i32, %c0_i32_0 : i32, i32
  }
  func.func @transform_7(%arg0: i32) -> (i32, i32) {
    %c0_i32 = arith.constant 0 : i32
    %c0_i32_0 = arith.constant 0 : i32
    return %arg0, %c0_i32 : i32, i32
  }
}

module attributes {stable_mosaic.version = 11 : i64} {
  func.func @_ffn_kernel_resident(%arg0: i32, %arg1: memref<16x32xf32, #tpu.memory_space<vmem>>, %arg2: memref<1x32xf32, #tpu.memory_space<vmem>>, %arg3: memref<1x32xf32, #tpu.memory_space<vmem>>, %arg4: memref<32x128xbf16, #tpu.memory_space<vmem>>, %arg5: memref<1x128xf32, #tpu.memory_space<vmem>>, %arg6: memref<128x32xbf16, #tpu.memory_space<vmem>>, %arg7: memref<1x32xf32, #tpu.memory_space<vmem>>, %arg8: memref<16x32xf32, #tpu.memory_space<vmem>>) attributes {dimension_semantics = [#tpu.dimension_semantics<parallel>], iteration_bounds = array<i64: 1>, scalar_prefetch = 0 : i64, scratch_operands = 0 : i64, tpu.core_type = #tpu.core_type<tc>, window_params = [{transform_indices = @transform_0, window_bounds = array<i64: 16, 32>}, {pipeline_mode = #tpu.pipeline_mode<synchronous>, transform_indices = @transform_1, window_bounds = array<i64: 1, 32>}, {pipeline_mode = #tpu.pipeline_mode<synchronous>, transform_indices = @transform_2, window_bounds = array<i64: 1, 32>}, {pipeline_mode = #tpu.pipeline_mode<synchronous>, transform_indices = @transform_3, window_bounds = array<i64: 32, 128>}, {pipeline_mode = #tpu.pipeline_mode<synchronous>, transform_indices = @transform_4, window_bounds = array<i64: 1, 128>}, {pipeline_mode = #tpu.pipeline_mode<synchronous>, transform_indices = @transform_5, window_bounds = array<i64: 128, 32>}, {pipeline_mode = #tpu.pipeline_mode<synchronous>, transform_indices = @transform_6, window_bounds = array<i64: 1, 32>}, {transform_indices = @transform_7, window_bounds = array<i64: 16, 32>}]} {
    %c0 = arith.constant 0 : index
    %c0_0 = arith.constant 0 : index
    %0 = vector.load %arg1[%c0, %c0_0] : memref<16x32xf32, #tpu.memory_space<vmem>>, vector<16x32xf32>
    %cst = arith.constant dense<0.000000e+00> : vector<16xf32>
    %1 = vector.multi_reduction <add>, %0, %cst [1] : vector<16x32xf32> to vector<16xf32>
    %2 = vector.shape_cast %1 : vector<16xf32> to vector<16x1xf32>
    %cst_1 = arith.constant 3.200000e+01 : f32
    %3 = vector.broadcast %cst_1 : f32 to vector<16x1xf32>
    %4 = arith.divf %2, %3 : vector<16x1xf32>
    %5 = vector.broadcast %4 : vector<16x1xf32> to vector<16x32xf32>
    %6 = arith.subf %0, %5 : vector<16x32xf32>
    %7 = arith.mulf %6, %6 : vector<16x32xf32>
    %cst_2 = arith.constant dense<0.000000e+00> : vector<16xf32>
    %8 = vector.multi_reduction <add>, %7, %cst_2 [1] : vector<16x32xf32> to vector<16xf32>
    %9 = vector.shape_cast %8 : vector<16xf32> to vector<16x1xf32>
    %cst_3 = arith.constant 3.200000e+01 : f32
    %10 = vector.broadcast %cst_3 : f32 to vector<16x1xf32>
    %11 = arith.divf %9, %10 : vector<16x1xf32>
    %cst_4 = arith.constant 9.99999974E-6 : f32
    %12 = vector.broadcast %cst_4 : f32 to vector<16x1xf32>
    %13 = arith.addf %11, %12 : vector<16x1xf32>
    %14 = math.rsqrt %13 : vector<16x1xf32>
    %15 = vector.broadcast %14 : vector<16x1xf32> to vector<16x32xf32>
    %16 = arith.mulf %6, %15 : vector<16x32xf32>
    %c0_5 = arith.constant 0 : index
    %c0_6 = arith.constant 0 : index
    %17 = vector.load %arg2[%c0_5, %c0_6] : memref<1x32xf32, #tpu.memory_space<vmem>>, vector<1x32xf32>
    %18 = vector.broadcast %17 : vector<1x32xf32> to vector<16x32xf32>
    %19 = arith.mulf %16, %18 : vector<16x32xf32>
    %c0_7 = arith.constant 0 : index
    %c0_8 = arith.constant 0 : index
    %20 = vector.load %arg3[%c0_7, %c0_8] : memref<1x32xf32, #tpu.memory_space<vmem>>, vector<1x32xf32>
    %21 = vector.broadcast %20 : vector<1x32xf32> to vector<16x32xf32>
    %22 = arith.addf %19, %21 : vector<16x32xf32>
    %23 = arith.truncf %22 : vector<16x32xf32> to vector<16x32xbf16>
    %c0_9 = arith.constant 0 : index
    %c0_10 = arith.constant 0 : index
    %24 = vector.load %arg4[%c0_9, %c0_10] : memref<32x128xbf16, #tpu.memory_space<vmem>>, vector<32x128xbf16>
    %cst_11 = arith.constant dense<0.000000e+00> : vector<16x128xf32>
    %25 = tpu.matmul %23, %24, %cst_11 {dimension_numbers = #tpu.dot_dimension_numbers<[1], [0], [0], [1], [0, 0, 1, 1], [], []>} : vector<16x32xbf16>, vector<32x128xbf16>, vector<16x128xf32> -> vector<16x128xf32>
    %26 = arith.truncf %25 : vector<16x128xf32> to vector<16x128xbf16>
    %c0_12 = arith.constant 0 : index
    %c0_13 = arith.constant 0 : index
    %27 = vector.load %arg5[%c0_12, %c0_13] : memref<1x128xf32, #tpu.memory_space<vmem>>, vector<1x128xf32>
    %28 = arith.truncf %27 : vector<1x128xf32> to vector<1x128xbf16>
    %29 = vector.broadcast %28 : vector<1x128xbf16> to vector<16x128xbf16>
    %30 = arith.addf %26, %29 : vector<16x128xbf16>
    %cst_14 = arith.constant 5.000000e-01 : bf16
    %31 = vector.broadcast %cst_14 : bf16 to vector<16x128xbf16>
    %32 = arith.mulf %31, %30 : vector<16x128xbf16>
    %cst_15 = arith.constant 7.070310e-01 : bf16
    %33 = vector.broadcast %cst_15 : bf16 to vector<16x128xbf16>
    %34 = arith.mulf %30, %33 : vector<16x128xbf16>
    %35 = math.erf %34 : vector<16x128xbf16>
    %cst_16 = arith.constant 1.000000e+00 : bf16
    %36 = vector.broadcast %cst_16 : bf16 to vector<16x128xbf16>
    %37 = arith.addf %36, %35 : vector<16x128xbf16>
    %38 = arith.mulf %32, %37 : vector<16x128xbf16>
    %c0_17 = arith.constant 0 : index
    %c0_18 = arith.constant 0 : index
    %39 = vector.load %arg6[%c0_17, %c0_18] : memref<128x32xbf16, #tpu.memory_space<vmem>>, vector<128x32xbf16>
    %cst_19 = arith.constant dense<0.000000e+00> : vector<16x32xf32>
    %40 = tpu.matmul %38, %39, %cst_19 {dimension_numbers = #tpu.dot_dimension_numbers<[1], [0], [0], [1], [0, 0, 1, 1], [], []>} : vector<16x128xbf16>, vector<128x32xbf16>, vector<16x32xf32> -> vector<16x32xf32>
    %c0_20 = arith.constant 0 : index
    %c0_21 = arith.constant 0 : index
    %41 = vector.load %arg7[%c0_20, %c0_21] : memref<1x32xf32, #tpu.memory_space<vmem>>, vector<1x32xf32>
    %42 = vector.broadcast %41 : vector<1x32xf32> to vector<16x32xf32>
    %43 = arith.addf %40, %42 : vector<16x32xf32>
    %c0_22 = arith.constant 0 : index
    %c0_23 = arith.constant 0 : index
    %44 = vector.load %arg8[%c0_22, %c0_23] : memref<16x32xf32, #tpu.memory_space<vmem>>, vector<16x32xf32>
    tpu.vector_store %arg8[%c0_22, %c0_23], %43 {strides = array<i32>} : memref<16x32xf32, #tpu.memory_space<vmem>>, vector<16x32xf32>,
    return
  }
  func.func @transform_0(%arg0: i32) -> (i32, i32) {
    %c0_i32 = arith.constant 0 : i32
    %c0_i32_0 = arith.constant 0 : i32
    return %arg0, %c0_i32 : i32, i32
  }
  func.func @transform_1(%arg0: i32) -> (i32, i32) {
    %c0_i32 = arith.constant 0 : i32
    %c0_i32_0 = arith.constant 0 : i32
    %c0_i32_1 = arith.constant 0 : i32
    return %c0_i32, %c0_i32_0 : i32, i32
  }
  func.func @transform_2(%arg0: i32) -> (i32, i32) {
    %c0_i32 = arith.constant 0 : i32
    %c0_i32_0 = arith.constant 0 : i32
    %c0_i32_1 = arith.constant 0 : i32
    return %c0_i32, %c0_i32_0 : i32, i32
  }
  func.func @transform_3(%arg0: i32) -> (i32, i32) {
    %c0_i32 = arith.constant 0 : i32
    %c0_i32_0 = arith.constant 0 : i32
    %c0_i32_1 = arith.constant 0 : i32
    return %c0_i32, %c0_i32_0 : i32, i32
  }
  func.func @transform_4(%arg0: i32) -> (i32, i32) {
    %c0_i32 = arith.constant 0 : i32
    %c0_i32_0 = arith.constant 0 : i32
    %c0_i32_1 = arith.constant 0 : i32
    return %c0_i32, %c0_i32_0 : i32, i32
  }
  func.func @transform_5(%arg0: i32) -> (i32, i32) {
    %c0_i32 = arith.constant 0 : i32
    %c0_i32_0 = arith.constant 0 : i32
    %c0_i32_1 = arith.constant 0 : i32
    return %c0_i32, %c0_i32_0 : i32, i32
  }
  func.func @transform_6(%arg0: i32) -> (i32, i32) {
    %c0_i32 = arith.constant 0 : i32
    %c0_i32_0 = arith.constant 0 : i32
    %c0_i32_1 = arith.constant 0 : i32
    return %c0_i32, %c0_i32_0 : i32, i32
  }
  func.func @transform_7(%arg0: i32) -> (i32, i32) {
    %c0_i32 = arith.constant 0 : i32
    %c0_i32_0 = arith.constant 0 : i32
    return %arg0, %c0_i32 : i32, i32
  }
}

</mosaic_0001>

<bundles_post_ra>
// kernel: tpu_custom_call.1
= control target key start
LH: loop header
LB: loop body
LE: loop exit
PB: predicated region body
PF: predicated region fallthrough
CT: control target
= control target key end

     0   :  { %vm30_vm0 = vcmask 261120   ;;  %s568_s0 = inlined_call_operand.vmem [shape: f32[16,32], index: 0, kind: input, shape index: {}]   ;;  %s569_s1 = inlined_call_operand.vmem [shape: f32[1,32], index: 1, kind: input, shape index: {}]   ;;  %s570_s2 = inlined_call_operand.vmem [shape: f32[1,32], index: 2, kind: input, shape index: {}]   ;;  %s571_s3 = inlined_call_operand.vmem [shape: bf16[32,128], index: 3, kind: input, shape index: {}]   ;;  %s572_s4 = inlined_call_operand.vmem [shape: f32[1,128], index: 4, kind: input, shape index: {}]   ;;  %s573_s5 = inlined_call_operand.vmem [shape: bf16[128,32], index: 5, kind: input, shape index: {}]   ;;  %s574_s6 = inlined_call_operand.vmem [shape: f32[1,32], index: 6, kind: input, shape index: {}]   ;;  %s575_s7 = inlined_call_operand.hbm [shape: f32[16,32], index: 7, kind: output, shape index: {}]  }
   0x1   :  { %v28_v0 = vld [vmem:[%s568_s0] sm:$0xff] }
   0x2   :  { %v31_v1 = vsel %vm30_vm0, %v28_v0, 0.0 }
   0x3   :  { %32 = vadd.xlane.f32.xlu0 %v31_v1 }
   0x4   :  { %12 = vsyncpa [#allocation3], 0  ;;  %v29_v2 = vld [vmem:[%s568_s0 + $0x8] sm:$0xff]  ;;  %v448_v4 = vmov 32.0   ;;  %v395_v23 = vld [vmem:[%s571_s3] sm:$0xff]  ;;  %s449_s27 = smov [#allocation2]  }
   0x5   :  { %v34_v3 = vsel %vm30_vm0, %v29_v2, 0.0  ;;  %412 = vrcp.f32 %v448_v4  ;;  %v396_v21 = vld [vmem:[%s571_s3 + $0x8] sm:$0xff]  ;;  %v409_v42 = vld [vmem:[%s569_s1] ss:$0 sm:$0xff]  ;;  %s338_s0 = sshll.u32 %s449_s27, 4  ;;  %s340_s30 = sshll.u32 %s575_s7, 4  ;;  %s339_s0 = int_to_ptr.vmem [resolvable:$true] %s338_s0  ;;  %s341_s30 = int_to_ptr.hbm [resolvable:$true] %s340_s30 }
   0x6   :  { %120 = vmatpush.bf16.msra.mxu0 %v396_v21  ;;  %v410_v47 = vld [vmem:[%s570_s2] ss:$0 sm:$0xff]  ;;  %s450_s3 = smov 128   ;;  %s451_s8 = smov 8  }
   0x7   :  { %v130_v52 = vld [vmem:[%s572_s4] sm:$0x1] }
   0x8   :  { %v131_v53 = vpack.c.bf16 %v130_v52, %v130_v52 }
   0xa   :  { %121 = vmatpush.bf16.msra.mxu0 %v395_v23  ;;  %v133_v54 = vpack.i.b16 %v131_v53, %v131_v53 }
   0xb   :  { %35 = vadd.xlane.f32.xlu0 %v34_v3  ;;  %v413_v5 = vpop.eup %412 }
   0xc   :  { %v38_v6 = vmul.f32 32.0, %v413_v5  ;;  %vm42_vm1 = vweird.f32 %v413_v5  ;;  %v135_v55 = vperm.slane %v133_v54, 0 }
   0xe   :  { %v39_v7 = vsub.f32 1.0, %v38_v6  ;;  %v138_v58 = vunpack.c.l.bf16 %v135_v55 }
  0x10   :  { %v40_v8 = vmul.f32 %v413_v5, %v39_v7 }
  0x12   :  { %v41_v9 = vadd.f32 %v413_v5, %v40_v8 }
  0x14   :  { %v43_v10 = vsel %vm42_vm1, %v413_v5, %v41_v9  ;;  %v404_v9 = vld [vmem:[%s573_s5 + $0x38] sm:$0xff] }
  0x15   :  { %318 = vmatpush.bf16.msra.mxu1 %v404_v9 }
  0x76   :  { %v33_v11 = vpop.xlane.xlu0 %32 }
  0x77   :  { %v44_v12 = vmul.f32 %v43_v10, %v33_v11 }
  0x79   :  { %v46_v13 = vsub.f32 %v28_v0, %v44_v12  ;;  %v403_v12 = vld [vmem:[%s573_s5 + $0x30] sm:$0xff] }
  0x7a   :  { %319 = vmatpush.bf16.msra.mxu1 %v403_v12 }
  0x7b   :  { %v48_v14 = vmul.f32 %v46_v13, %v46_v13 }
  0x7d   :  { %v50_v15 = vsel %vm30_vm0, %v48_v14, 0.0 }
  0x7e   :  { %51 = vadd.xlane.f32.xlu1 %v50_v15  ;;  %v36_v16 = vpop.xlane.xlu0 %35 }
  0x7f   :  { %v45_v17 = vmul.f32 %v43_v10, %v36_v16 }
  0x81   :  { %v47_v18 = vsub.f32 %v29_v2, %v45_v17 }
  0x83   :  { %v49_v19 = vmul.f32 %v47_v18, %v47_v18 }
  0x85   :  { %v53_v20 = vsel %vm30_vm0, %v49_v19, 0.0 }
  0x86   :  { %54 = vadd.xlane.f32.xlu1 %v53_v20 }
  0xf1   :  { %v52_v22 = vpop.xlane.xlu1 %51 }
  0xf2   :  { %v56_v24 = vmul.f32 %v52_v22, %v43_v10 }
  0xf4   :  { %v58_v25 = vadd.f32 1e-05, %v56_v24  ;;  %v401_v24 = vld [vmem:[%s573_s5 + $0x20] sm:$0xff] }
  0xf6   :  { %414 = vrsqrt.f32 %v58_v25  ;;  %vm66_vm3 = vweird.f32 %v58_v25 }
  0xf9   :  { %v55_v26 = vpop.xlane.xlu1 %54 }
  0xfa   :  { %v57_v27 = vmul.f32 %v55_v26, %v43_v10 }
  0xfc   :  { %v415_v28 = vpop.eup %414  ;;  %v59_v29 = vadd.f32 1e-05, %v57_v27 }
  0xfd   :  { %v61_v30 = vmul.f32 %v415_v28, %v58_v25  ;;  %vm67_vm2 = vweird.f32 %v415_v28 }
  0xfe   :  { %416 = vrsqrt.f32 %v59_v29  ;;  %vm68_vm4 = vmor %vm66_vm3, %vm67_vm2  ;;  %vm76_vm6 = vweird.f32 %v59_v29 }
  0xff   :  { %v62_v31 = vmul.f32 %v415_v28, %v61_v30 }
 0x101   :  { %v63_v32 = vmul.f32 0.5, %v62_v31  ;;  %v400_v31 = vld [vmem:[%s573_s5 + $0x18] sm:$0xff] }
 0x103   :  { %v64_v33 = vsub.f32 1.5, %v63_v32 }
 0x104   :  { %v417_v34 = vpop.eup %416 }
 0x105   :  { %v65_v35 = vmul.f32 %v415_v28, %v64_v33  ;;  %v71_v36 = vmul.f32 %v417_v34, %v59_v29  ;;  %vm77_vm5 = vweird.f32 %v417_v34 }
 0x106   :  { %vm78_vm7 = vmor %vm76_vm6, %vm77_vm5 }
 0x107   :  { %v72_v37 = vmul.f32 %v417_v34, %v71_v36  ;;  %v69_v38 = vsel %vm68_vm4, %v415_v28, %v65_v35 }
 0x108   :  { %v80_v41 = vmul.f32 %v69_v38, %v46_v13  ;;  %v399_v38 = vld [vmem:[%s573_s5 + $0x10] sm:$0xff] }
 0x109   :  { %v73_v39 = vmul.f32 0.5, %v72_v37 }
 0x10a   :  { %v86_v46 = vmul.f32 %v409_v42, %v80_v41 }
 0x10b   :  { %v74_v40 = vsub.f32 1.5, %v73_v39 }
 0x10c   :  { %v92_v49 = vadd.f32 %v410_v47, %v86_v46 }
 0x10d   :  { %v75_v43 = vmul.f32 %v417_v34, %v74_v40 }
 0x10f   :  { %v79_v44 = vsel %vm78_vm7, %v417_v34, %v75_v43 }
 0x110   :  { %v81_v45 = vmul.f32 %v79_v44, %v47_v18  ;;  %v402_v18 = vld [vmem:[%s573_s5 + $0x28] sm:$0xff] }
 0x111   :  { %320 = vmatpush.bf16.msra.mxu1 %v402_v18 }
 0x112   :  { %v87_v48 = vmul.f32 %v409_v42, %v81_v45  ;;  %v398_v45 = vld [vmem:[%s573_s5 + $0x8] sm:$0xff] }
 0x114   :  { %v93_v50 = vadd.f32 %v410_v47, %v87_v48 }
 0x115   :  { %321 = vmatpush.bf16.msra.mxu1 %v401_v24 }
 0x116   :  { %v94_v51 = vpack.c.bf16 %v93_v50, %v92_v49 }
 0x118   :  { %360 = vmatmul.msk.bf16.vlgmr.msra.gmra.mxu0 %vm30_vm0, %v94_v51  ;;  %v397_v51 = vld [vmem:[%s573_s5] sm:$0xff] }
 0x119   :  { %322 = vmatpush.bf16.msra.mxu1 %v400_v31 }
 0x11d   :  { %323 = vmatpush.bf16.msra.mxu1 %v399_v38 }
 0x121   :  { %324 = vmatpush.bf16.msra.mxu1 %v398_v45 }
 0x125   :  { %325 = vmatpush.bf16.msra.mxu1 %v397_v51 }
 0x195   :  { %v123_v56 = vpop.f32.mrf.mxu0 }
 0x196   :  { %v128_v57 = vpack.c.bf16 %v123_v56, %v123_v56 }
 0x198   :  { %v136_v59 = vunpack.c.l.bf16 %v128_v57 }
 0x19a   :  { %v139_v60 = vadd.f32 %v138_v58, %v136_v59 }
 0x19c   :  { %v141_v61 = vpack.c.bf16 %v139_v60, %v139_v60 }
 0x19d   :  { %v125_v62 = vpop.f32.mrf.mxu0 }
 0x19e   :  { %v518_v63 = vunpack.c.l.bf16 %v141_v61  ;;  %v129_v0 = vpack.c.bf16 %v125_v62, %v125_v62 }
 0x1a0   :  { %v149_v1 = vmul.f32 0.70703125, %v518_v63  ;;  %v137_v2 = vunpack.c.l.bf16 %v129_v0  ;;  %v145_v31 = vmul.f32 0.5, %v518_v63  ;;  %v411_v63 = vld [vmem:[%s574_s6] ss:$0 sm:$0xff] }
 0x1a2   :  { %v151_v3 = vpack.c.bf16 %v149_v1, %v149_v1  ;;  %v140_v4 = vadd.f32 %v138_v58, %v137_v2 }
 0x1a4   :  { %v521_v5 = vunpack.c.l.bf16 %v151_v3  ;;  %v142_v6 = vpack.c.bf16 %v140_v4, %v140_v4 }
 0x1a6   :  { %v155_v7 = vmul.f32 %v521_v5, %v521_v5  ;;  %v525_v8 = vunpack.c.l.bf16 %v142_v6 }
 0x1a8   :  { %v156_v10 = vmin.f32 %v155_v7, 16.0  ;;  %v150_v11 = vmul.f32 0.70703125, %v525_v8 }
 0x1aa   :  { %v157_v13 = vmul.f32 2.1237322e-06, %v156_v10  ;;  %v152_v14 = vpack.c.bf16 %v150_v11, %v150_v11  ;;  %v168_v15 = vmul.f32 3.8918573e-05, %v156_v10 }
 0x1ac   :  { %v158_v16 = vadd.f32 0.00028619796, %v157_v13  ;;  %v534_v17 = vunpack.c.l.bf16 %v152_v14  ;;  %v169_v19 = vadd.f32 0.001143296, %v168_v15 }
 0x1ae   :  { %v159_v20 = vmul.f32 %v158_v16, %v156_v10  ;;  %v195_v21 = vmul.f32 %v534_v17, %v534_v17  ;;  %v170_v22 = vmul.f32 %v169_v19, %v156_v10 }
 0x1b0   :  { %v196_v23 = vmin.f32 %v195_v21, 16.0  ;;  %v171_v25 = vadd.f32 0.014752088, %v170_v22  ;;  %v160_v26 = vadd.f32 0.0036580483, %v159_v20 }
 0x1b2   :  { %v197_v27 = vmul.f32 2.1237322e-06, %v196_v23  ;;  %v172_v28 = vmul.f32 %v171_v25, %v156_v10  ;;  %v208_v29 = vmul.f32 3.8918573e-05, %v196_v23  ;;  %v161_v33 = vmul.f32 %v160_v26, %v156_v10 }
 0x1b4   :  { %v198_v30 = vadd.f32 0.00028619796, %v197_v27  ;;  %v173_v32 = vadd.f32 0.112945676, %v172_v28  ;;  %v209_v34 = vadd.f32 0.001143296, %v208_v29 }
 0x1b5   :  { %v162_v40 = vadd.f32 0.05243302, %v161_v33 }
 0x1b6   :  { %v199_v35 = vmul.f32 %v198_v30, %v196_v23  ;;  %v174_v36 = vmul.f32 %v173_v32, %v156_v10  ;;  %v210_v37 = vmul.f32 %v209_v34, %v196_v23  ;;  %v146_v32 = vmul.f32 0.5, %v525_v8 }
 0x1b7   :  { %v163_v47 = vmul.f32 %v162_v40, %v156_v10 }
 0x1b8   :  { %v175_v39 = vadd.f32 0.4994258, %v174_v36  ;;  %v211_v41 = vadd.f32 0.014752088, %v210_v37  ;;  %v200_v42 = vadd.f32 0.0036580483, %v199_v35  ;;  %v148_v36 = vpack.c.bf16 %v146_v32, %v146_v32 }
 0x1b9   :  { %v164_v52 = vadd.f32 0.18741608, %v163_v47  ;;  %v147_v37 = vpack.c.bf16 %v145_v31, %v145_v31 }
 0x1ba   :  { %v176_v43 = vmul.f32 %v175_v39, %v156_v10  ;;  %v212_v44 = vmul.f32 %v211_v41, %v196_v23  ;;  %v201_v49 = vmul.f32 %v200_v42, %v196_v23  ;;  %v244_v41 = vunpack.c.l.bf16 %v148_v36 }
 0x1bb   :  { %v165_v57 = vmul.f32 %v164_v52, %v156_v10 }
 0x1bc   :  { %v177_v46 = vadd.f32 1.0, %v176_v43  ;;  %v213_v48 = vadd.f32 0.112945676, %v212_v44  ;;  %v202_v54 = vadd.f32 0.05243302, %v201_v49 }
 0x1bd   :  { %v166_v0 = vadd.f32 1.1283791, %v165_v57 }
 0x1be   :  { %418 = vrcp.f32 %v177_v46  ;;  %v214_v50 = vmul.f32 %v213_v48, %v196_v23  ;;  %v203_v60 = vmul.f32 %v202_v54, %v196_v23  ;;  %v189_v62 = vand.u32 2147483648, %v177_v46 }
 0x1bf   :  { %v187_v2 = vand.u32 2147483647, %v177_v46  ;;  %vm183_vm9 = vweird.f32 %v177_v46  ;;  %v167_v9 = vmul.f32 %v166_v0, %v521_v5 }
 0x1c0   :  { %v215_v53 = vadd.f32 0.4994258, %v214_v50  ;;  %v204_v3 = vadd.f32 0.18741608, %v203_v60  ;;  %v190_v6 = vor.u32 1.1754944e-38, %v189_v62 }
 0x1c1   :  { %vm188_vm11 = vcmp.eq.f32.partialorder %v187_v2, 8.507059e+37 }
 0x1c2   :  { %v216_v55 = vmul.f32 %v215_v53, %v196_v23  ;;  %v205_v10 = vmul.f32 %v204_v3, %v196_v23 }
 0x1c4   :  { %v419_v56 = vpop.eup %418  ;;  %v217_v59 = vadd.f32 1.0, %v216_v55  ;;  %v206_v19 = vadd.f32 1.1283791, %v205_v10 }
 0x1c5   :  { %v179_v58 = vmul.f32 %v419_v56, %v177_v46  ;;  %vm184_vm8 = vweird.f32 %v419_v56 }
 0x1c6   :  { %420 = vrcp.f32 %v217_v59  ;;  %vm185_vm10 = vmor %vm183_vm9, %vm184_vm8  ;;  %v229_v18 = vand.u32 2147483648, %v217_v59  ;;  %v227_v21 = vand.u32 2147483647, %v217_v59  ;;  %vm223_vm13 = vweird.f32 %v217_v59 }
 0x1c7   :  { %v180_v61 = vsub.f32 1.0, %v179_v58  ;;  %v207_v5 = vmul.f32 %v206_v19, %v534_v17  ;;  %v243_v17 = vunpack.c.l.bf16 %v147_v37 }
 0x1c8   :  { %v230_v25 = vor.u32 1.1754944e-38, %v229_v18  ;;  %vm228_vm15 = vcmp.eq.f32.partialorder %v227_v21, 8.507059e+37 }
 0x1c9   :  { %v181_v1 = vmul.f32 %v419_v56, %v180_v61 }
 0x1cb   :  { %v182_v4 = vadd.f32 %v419_v56, %v181_v1 }
 0x1cc   :  { %v421_v7 = vpop.eup %420 }
 0x1cd   :  { %v186_v11 = vsel %vm185_vm10, %v419_v56, %v182_v4  ;;  %v219_v13 = vmul.f32 %v421_v7, %v217_v59  ;;  %vm224_vm12 = vweird.f32 %v421_v7 }
 0x1ce   :  { %v191_v12 = vsel %vm188_vm11, %v190_v6, %v186_v11  ;;  %vm225_vm14 = vmor %vm223_vm13, %vm224_vm12 }
 0x1cf   :  { %v192_v14 = vmul.f32 %v191_v12, %v167_v9  ;;  %v220_v15 = vsub.f32 1.0, %v219_v13 }
 0x1d1   :  { %v361_v16 = vclamps-f32 %v192_v14, 1.0  ;;  %v221_v20 = vmul.f32 %v421_v7, %v220_v15 }
 0x1d3   :  { %v235_v22 = vpack.c.bf16 %v361_v16, %v361_v16  ;;  %v222_v24 = vadd.f32 %v421_v7, %v221_v20 }
 0x1d5   :  { %v226_v26 = vsel %vm225_vm14, %v421_v7, %v222_v24  ;;  %v237_v23 = vunpack.c.l.bf16 %v235_v22 }
 0x1d6   :  { %v231_v27 = vsel %vm228_vm15, %v230_v25, %v226_v26 }
 0x1d7   :  { %v232_v28 = vmul.f32 %v231_v27, %v207_v5  ;;  %v239_v30 = vadd.f32 1.0, %v237_v23 }
 0x1d9   :  { %v362_v29 = vclamps-f32 %v232_v28, 1.0  ;;  %v241_v35 = vpack.c.bf16 %v239_v30, %v239_v30 }
 0x1db   :  { %v236_v33 = vpack.c.bf16 %v362_v29, %v362_v29  ;;  %v245_v40 = vunpack.c.l.bf16 %v241_v35 }
 0x1dd   :  { %v238_v34 = vunpack.c.l.bf16 %v236_v33  ;;  %v247_v43 = vmul.f32 %v245_v40, %v243_v17 }
 0x1df   :  { %v240_v38 = vadd.f32 1.0, %v238_v34 }
 0x1e1   :  { %v242_v39 = vpack.c.bf16 %v240_v38, %v240_v38 }
 0x1e3   :  { %v246_v42 = vunpack.c.l.bf16 %v242_v39 }
 0x1e5   :  { %v248_v44 = vmul.f32 %v246_v42, %v244_v41 }
 0x1e7   :  { %v249_v45 = vpack.c.bf16 %v248_v44, %v247_v43 }
 0x1e9   :  { %326 = vmatmul.bf16.vlgmr.msra.gmra.mxu1 %v249_v45 }
 0x266   :  { %v327_v8 = vpop.f32.mrf.mxu1 }
 0x267   :  { %v328_v46 = vadd.f32 %v411_v63, %v327_v8 }
 0x269   :  { %332 = vst.msk [vmem:[#allocation2] sm:$0xff] %vm30_vm0, %v328_v46 }
 0x26e   :  { %v329_v47 = vpop.f32.mrf.mxu1 }
 0x26f   :  { %v330_v48 = vadd.f32 %v411_v63, %v329_v47 }
 0x271   :  { %333 = vst.msk [vmem:[#allocation2 + $0x8] sm:$0xff] %vm30_vm0, %v330_v48 }
 0x272   :  { %346 = dma.vmem_to_hbm [thread:$0]  %s339_s0, 256, %s341_s30, [#allocation3], %s450_s3, %s450_s3, %s451_s8  }
 0x273   :  { %446 = dma.done.wait [#allocation3], 256  }
 0x274   :  { %447 = vsyncadd [#allocation3], 4294967040 }
 0x275   :  { %351 = vsyncpa [#allocation3], 1 }

// kernel: tpu_custom_call.1
= control target key start
LH: loop header
LB: loop body
LE: loop exit
PB: predicated region body
PF: predicated region fallthrough
CT: control target
= control target key end

     0   :  { %vm30_vm0 = vcmask 261120   ;;  %s568_s0 = inlined_call_operand.vmem [shape: f32[16,32], index: 0, kind: input, shape index: {}]   ;;  %s569_s1 = inlined_call_operand.vmem [shape: f32[1,32], index: 1, kind: input, shape index: {}]   ;;  %s570_s2 = inlined_call_operand.vmem [shape: f32[1,32], index: 2, kind: input, shape index: {}]   ;;  %s571_s3 = inlined_call_operand.vmem [shape: bf16[32,128], index: 3, kind: input, shape index: {}]   ;;  %s572_s4 = inlined_call_operand.vmem [shape: f32[1,128], index: 4, kind: input, shape index: {}]   ;;  %s573_s5 = inlined_call_operand.vmem [shape: bf16[128,32], index: 5, kind: input, shape index: {}]   ;;  %s574_s6 = inlined_call_operand.vmem [shape: f32[1,32], index: 6, kind: input, shape index: {}]   ;;  %s575_s7 = inlined_call_operand.hbm [shape: f32[16,32], index: 7, kind: output, shape index: {}]  }
   0x1   :  { %v28_v0 = vld [vmem:[%s568_s0] sm:$0xff] }
   0x2   :  { %v31_v1 = vsel %vm30_vm0, %v28_v0, 0.0 }
   0x3   :  { %32 = vadd.xlane.f32.xlu0 %v31_v1 }
   0x4   :  { %12 = vsyncpa [#allocation3], 0  ;;  %v29_v2 = vld [vmem:[%s568_s0 + $0x8] sm:$0xff]  ;;  %v448_v4 = vmov 32.0   ;;  %v395_v23 = vld [vmem:[%s571_s3] sm:$0xff]  ;;  %s449_s27 = smov [#allocation2]  }
   0x5   :  { %v34_v3 = vsel %vm30_vm0, %v29_v2, 0.0  ;;  %412 = vrcp.f32 %v448_v4  ;;  %v396_v21 = vld [vmem:[%s571_s3 + $0x8] sm:$0xff]  ;;  %v409_v42 = vld [vmem:[%s569_s1] ss:$0 sm:$0xff]  ;;  %s338_s0 = sshll.u32 %s449_s27, 4  ;;  %s340_s30 = sshll.u32 %s575_s7, 4  ;;  %s339_s0 = int_to_ptr.vmem [resolvable:$true] %s338_s0  ;;  %s341_s30 = int_to_ptr.hbm [resolvable:$true] %s340_s30 }
   0x6   :  { %120 = vmatpush.bf16.msra.mxu0 %v396_v21  ;;  %v410_v47 = vld [vmem:[%s570_s2] ss:$0 sm:$0xff]  ;;  %s450_s3 = smov 128   ;;  %s451_s8 = smov 8  }
   0x7   :  { %v130_v52 = vld [vmem:[%s572_s4] sm:$0x1] }
   0x8   :  { %v131_v53 = vpack.c.bf16 %v130_v52, %v130_v52 }
   0xa   :  { %121 = vmatpush.bf16.msra.mxu0 %v395_v23  ;;  %v133_v54 = vpack.i.b16 %v131_v53, %v131_v53 }
   0xb   :  { %35 = vadd.xlane.f32.xlu0 %v34_v3  ;;  %v413_v5 = vpop.eup %412 }
   0xc   :  { %v38_v6 = vmul.f32 32.0, %v413_v5  ;;  %vm42_vm1 = vweird.f32 %v413_v5  ;;  %v135_v55 = vperm.slane %v133_v54, 0 }
   0xe   :  { %v39_v7 = vsub.f32 1.0, %v38_v6  ;;  %v138_v58 = vunpack.c.l.bf16 %v135_v55 }
  0x10   :  { %v40_v8 = vmul.f32 %v413_v5, %v39_v7 }
  0x12   :  { %v41_v9 = vadd.f32 %v413_v5, %v40_v8 }
  0x14   :  { %v43_v10 = vsel %vm42_vm1, %v413_v5, %v41_v9  ;;  %v404_v9 = vld [vmem:[%s573_s5 + $0x38] sm:$0xff] }
  0x15   :  { %318 = vmatpush.bf16.msra.mxu1 %v404_v9 }
  0x76   :  { %v33_v11 = vpop.xlane.xlu0 %32 }
  0x77   :  { %v44_v12 = vmul.f32 %v43_v10, %v33_v11 }
  0x79   :  { %v46_v13 = vsub.f32 %v28_v0, %v44_v12  ;;  %v403_v12 = vld [vmem:[%s573_s5 + $0x30] sm:$0xff] }
  0x7a   :  { %319 = vmatpush.bf16.msra.mxu1 %v403_v12 }
  0x7b   :  { %v48_v14 = vmul.f32 %v46_v13, %v46_v13 }
  0x7d   :  { %v50_v15 = vsel %vm30_vm0, %v48_v14, 0.0 }
  0x7e   :  { %51 = vadd.xlane.f32.xlu1 %v50_v15  ;;  %v36_v16 = vpop.xlane.xlu0 %35 }
  0x7f   :  { %v45_v17 = vmul.f32 %v43_v10, %v36_v16 }
  0x81   :  { %v47_v18 = vsub.f32 %v29_v2, %v45_v17 }
  0x83   :  { %v49_v19 = vmul.f32 %v47_v18, %v47_v18 }
  0x85   :  { %v53_v20 = vsel %vm30_vm0, %v49_v19, 0.0 }
  0x86   :  { %54 = vadd.xlane.f32.xlu1 %v53_v20 }
  0xf1   :  { %v52_v22 = vpop.xlane.xlu1 %51 }
  0xf2   :  { %v56_v24 = vmul.f32 %v52_v22, %v43_v10 }
  0xf4   :  { %v58_v25 = vadd.f32 1e-05, %v56_v24  ;;  %v401_v24 = vld [vmem:[%s573_s5 + $0x20] sm:$0xff] }
  0xf6   :  { %414 = vrsqrt.f32 %v58_v25  ;;  %vm66_vm3 = vweird.f32 %v58_v25 }
  0xf9   :  { %v55_v26 = vpop.xlane.xlu1 %54 }
  0xfa   :  { %v57_v27 = vmul.f32 %v55_v26, %v43_v10 }
  0xfc   :  { %v415_v28 = vpop.eup %414  ;;  %v59_v29 = vadd.f32 1e-05, %v57_v27 }
  0xfd   :  { %v61_v30 = vmul.f32 %v415_v28, %v58_v25  ;;  %vm67_vm2 = vweird.f32 %v415_v28 }
  0xfe   :  { %416 = vrsqrt.f32 %v59_v29  ;;  %vm68_vm4 = vmor %vm66_vm3, %vm67_vm2  ;;  %vm76_vm6 = vweird.f32 %v59_v29 }
  0xff   :  { %v62_v31 = vmul.f32 %v415_v28, %v61_v30 }
 0x101   :  { %v63_v32 = vmul.f32 0.5, %v62_v31  ;;  %v400_v31 = vld [vmem:[%s573_s5 + $0x18] sm:$0xff] }
 0x103   :  { %v64_v33 = vsub.f32 1.5, %v63_v32 }
 0x104   :  { %v417_v34 = vpop.eup %416 }
 0x105   :  { %v65_v35 = vmul.f32 %v415_v28, %v64_v33  ;;  %v71_v36 = vmul.f32 %v417_v34, %v59_v29  ;;  %vm77_vm5 = vweird.f32 %v417_v34 }
 0x106   :  { %vm78_vm7 = vmor %vm76_vm6, %vm77_vm5 }
 0x107   :  { %v72_v37 = vmul.f32 %v417_v34, %v71_v36  ;;  %v69_v38 = vsel %vm68_vm4, %v415_v28, %v65_v35 }
 0x108   :  { %v80_v41 = vmul.f32 %v69_v38, %v46_v13  ;;  %v399_v38 = vld [vmem:[%s573_s5 + $0x10] sm:$0xff] }
 0x109   :  { %v73_v39 = vmul.f32 0.5, %v72_v37 }
 0x10a   :  { %v86_v46 = vmul.f32 %v409_v42, %v80_v41 }
 0x10b   :  { %v74_v40 = vsub.f32 1.5, %v73_v39 }
 0x10c   :  { %v92_v49 = vadd.f32 %v410_v47, %v86_v46 }
 0x10d   :  { %v75_v43 = vmul.f32 %v417_v34, %v74_v40 }
 0x10f   :  { %v79_v44 = vsel %vm78_vm7, %v417_v34, %v75_v43 }
 0x110   :  { %v81_v45 = vmul.f32 %v79_v44, %v47_v18  ;;  %v402_v18 = vld [vmem:[%s573_s5 + $0x28] sm:$0xff] }
 0x111   :  { %320 = vmatpush.bf16.msra.mxu1 %v402_v18 }
 0x112   :  { %v87_v48 = vmul.f32 %v409_v42, %v81_v45  ;;  %v398_v45 = vld [vmem:[%s573_s5 + $0x8] sm:$0xff] }
 0x114   :  { %v93_v50 = vadd.f32 %v410_v47, %v87_v48 }
 0x115   :  { %321 = vmatpush.bf16.msra.mxu1 %v401_v24 }
 0x116   :  { %v94_v51 = vpack.c.bf16 %v93_v50, %v92_v49 }
 0x118   :  { %360 = vmatmul.msk.bf16.vlgmr.msra.gmra.mxu0 %vm30_vm0, %v94_v51  ;;  %v397_v51 = vld [vmem:[%s573_s5] sm:$0xff] }
 0x119   :  { %322 = vmatpush.bf16.msra.mxu1 %v400_v31 }
 0x11d   :  { %323 = vmatpush.bf16.msra.mxu1 %v399_v38 }
 0x121   :  { %324 = vmatpush.bf16.msra.mxu1 %v398_v45 }
 0x125   :  { %325 = vmatpush.bf16.msra.mxu1 %v397_v51 }
 0x195   :  { %v123_v56 = vpop.f32.mrf.mxu0 }
 0x196   :  { %v128_v57 = vpack.c.bf16 %v123_v56, %v123_v56 }
 0x198   :  { %v136_v59 = vunpack.c.l.bf16 %v128_v57 }
 0x19a   :  { %v139_v60 = vadd.f32 %v138_v58, %v136_v59 }
 0x19c   :  { %v141_v61 = vpack.c.bf16 %v139_v60, %v139_v60 }
 0x19d   :  { %v125_v62 = vpop.f32.mrf.mxu0 }
 0x19e   :  { %v518_v63 = vunpack.c.l.bf16 %v141_v61  ;;  %v129_v0 = vpack.c.bf16 %v125_v62, %v125_v62 }
 0x1a0   :  { %v149_v1 = vmul.f32 0.70703125, %v518_v63  ;;  %v137_v2 = vunpack.c.l.bf16 %v129_v0  ;;  %v145_v31 = vmul.f32 0.5, %v518_v63  ;;  %v411_v63 = vld [vmem:[%s574_s6] ss:$0 sm:$0xff] }
 0x1a2   :  { %v151_v3 = vpack.c.bf16 %v149_v1, %v149_v1  ;;  %v140_v4 = vadd.f32 %v138_v58, %v137_v2 }
 0x1a4   :  { %v521_v5 = vunpack.c.l.bf16 %v151_v3  ;;  %v142_v6 = vpack.c.bf16 %v140_v4, %v140_v4 }
 0x1a6   :  { %v155_v7 = vmul.f32 %v521_v5, %v521_v5  ;;  %v525_v8 = vunpack.c.l.bf16 %v142_v6 }
 0x1a8   :  { %v156_v10 = vmin.f32 %v155_v7, 16.0  ;;  %v150_v11 = vmul.f32 0.70703125, %v525_v8 }
 0x1aa   :  { %v157_v13 = vmul.f32 2.1237322e-06, %v156_v10  ;;  %v152_v14 = vpack.c.bf16 %v150_v11, %v150_v11  ;;  %v168_v15 = vmul.f32 3.8918573e-05, %v156_v10 }
 0x1ac   :  { %v158_v16 = vadd.f32 0.00028619796, %v157_v13  ;;  %v534_v17 = vunpack.c.l.bf16 %v152_v14  ;;  %v169_v19 = vadd.f32 0.001143296, %v168_v15 }
 0x1ae   :  { %v159_v20 = vmul.f32 %v158_v16, %v156_v10  ;;  %v195_v21 = vmul.f32 %v534_v17, %v534_v17  ;;  %v170_v22 = vmul.f32 %v169_v19, %v156_v10 }
 0x1b0   :  { %v196_v23 = vmin.f32 %v195_v21, 16.0  ;;  %v171_v25 = vadd.f32 0.014752088, %v170_v22  ;;  %v160_v26 = vadd.f32 0.0036580483, %v159_v20 }
 0x1b2   :  { %v197_v27 = vmul.f32 2.1237322e-06, %v196_v23  ;;  %v172_v28 = vmul.f32 %v171_v25, %v156_v10  ;;  %v208_v29 = vmul.f32 3.8918573e-05, %v196_v23  ;;  %v161_v33 = vmul.f32 %v160_v26, %v156_v10 }
 0x1b4   :  { %v198_v30 = vadd.f32 0.00028619796, %v197_v27  ;;  %v173_v32 = vadd.f32 0.112945676, %v172_v28  ;;  %v209_v34 = vadd.f32 0.001143296, %v208_v29 }
 0x1b5   :  { %v162_v40 = vadd.f32 0.05243302, %v161_v33 }
 0x1b6   :  { %v199_v35 = vmul.f32 %v198_v30, %v196_v23  ;;  %v174_v36 = vmul.f32 %v173_v32, %v156_v10  ;;  %v210_v37 = vmul.f32 %v209_v34, %v196_v23  ;;  %v146_v32 = vmul.f32 0.5, %v525_v8 }
 0x1b7   :  { %v163_v47 = vmul.f32 %v162_v40, %v156_v10 }
 0x1b8   :  { %v175_v39 = vadd.f32 0.4994258, %v174_v36  ;;  %v211_v41 = vadd.f32 0.014752088, %v210_v37  ;;  %v200_v42 = vadd.f32 0.0036580483, %v199_v35  ;;  %v148_v36 = vpack.c.bf16 %v146_v32, %v146_v32 }
 0x1b9   :  { %v164_v52 = vadd.f32 0.18741608, %v163_v47  ;;  %v147_v37 = vpack.c.bf16 %v145_v31, %v145_v31 }
 0x1ba   :  { %v176_v43 = vmul.f32 %v175_v39, %v156_v10  ;;  %v212_v44 = vmul.f32 %v211_v41, %v196_v23  ;;  %v201_v49 = vmul.f32 %v200_v42, %v196_v23  ;;  %v244_v41 = vunpack.c.l.bf16 %v148_v36 }
 0x1bb   :  { %v165_v57 = vmul.f32 %v164_v52, %v156_v10 }
 0x1bc   :  { %v177_v46 = vadd.f32 1.0, %v176_v43  ;;  %v213_v48 = vadd.f32 0.112945676, %v212_v44  ;;  %v202_v54 = vadd.f32 0.05243302, %v201_v49 }
 0x1bd   :  { %v166_v0 = vadd.f32 1.1283791, %v165_v57 }
 0x1be   :  { %418 = vrcp.f32 %v177_v46  ;;  %v214_v50 = vmul.f32 %v213_v48, %v196_v23  ;;  %v203_v60 = vmul.f32 %v202_v54, %v196_v23  ;;  %v189_v62 = vand.u32 2147483648, %v177_v46 }
 0x1bf   :  { %v187_v2 = vand.u32 2147483647, %v177_v46  ;;  %vm183_vm9 = vweird.f32 %v177_v46  ;;  %v167_v9 = vmul.f32 %v166_v0, %v521_v5 }
 0x1c0   :  { %v215_v53 = vadd.f32 0.4994258, %v214_v50  ;;  %v204_v3 = vadd.f32 0.18741608, %v203_v60  ;;  %v190_v6 = vor.u32 1.1754944e-38, %v189_v62 }
 0x1c1   :  { %vm188_vm11 = vcmp.eq.f32.partialorder %v187_v2, 8.507059e+37 }
 0x1c2   :  { %v216_v55 = vmul.f32 %v215_v53, %v196_v23  ;;  %v205_v10 = vmul.f32 %v204_v3, %v196_v23 }
 0x1c4   :  { %v419_v56 = vpop.eup %418  ;;  %v217_v59 = vadd.f32 1.0, %v216_v55  ;;  %v206_v19 = vadd.f32 1.1283791, %v205_v10 }
 0x1c5   :  { %v179_v58 = vmul.f32 %v419_v56, %v177_v46  ;;  %vm184_vm8 = vweird.f32 %v419_v56 }
 0x1c6   :  { %420 = vrcp.f32 %v217_v59  ;;  %vm185_vm10 = vmor %vm183_vm9, %vm184_vm8  ;;  %v229_v18 = vand.u32 2147483648, %v217_v59  ;;  %v227_v21 = vand.u32 2147483647, %v217_v59  ;;  %vm223_vm13 = vweird.f32 %v217_v59 }
 0x1c7   :  { %v180_v61 = vsub.f32 1.0, %v179_v58  ;;  %v207_v5 = vmul.f32 %v206_v19, %v534_v17  ;;  %v243_v17 = vunpack.c.l.bf16 %v147_v37 }
 0x1c8   :  { %v230_v25 = vor.u32 1.1754944e-38, %v229_v18  ;;  %vm228_vm15 = vcmp.eq.f32.partialorder %v227_v21, 8.507059e+37 }
 0x1c9   :  { %v181_v1 = vmul.f32 %v419_v56, %v180_v61 }
 0x1cb   :  { %v182_v4 = vadd.f32 %v419_v56, %v181_v1 }
 0x1cc   :  { %v421_v7 = vpop.eup %420 }
 0x1cd   :  { %v186_v11 = vsel %vm185_vm10, %v419_v56, %v182_v4  ;;  %v219_v13 = vmul.f32 %v421_v7, %v217_v59  ;;  %vm224_vm12 = vweird.f32 %v421_v7 }
 0x1ce   :  { %v191_v12 = vsel %vm188_vm11, %v190_v6, %v186_v11  ;;  %vm225_vm14 = vmor %vm223_vm13, %vm224_vm12 }
 0x1cf   :  { %v192_v14 = vmul.f32 %v191_v12, %v167_v9  ;;  %v220_v15 = vsub.f32 1.0, %v219_v13 }
 0x1d1   :  { %v361_v16 = vclamps-f32 %v192_v14, 1.0  ;;  %v221_v20 = vmul.f32 %v421_v7, %v220_v15 }
 0x1d3   :  { %v235_v22 = vpack.c.bf16 %v361_v16, %v361_v16  ;;  %v222_v24 = vadd.f32 %v421_v7, %v221_v20 }
 0x1d5   :  { %v226_v26 = vsel %vm225_vm14, %v421_v7, %v222_v24  ;;  %v237_v23 = vunpack.c.l.bf16 %v235_v22 }
 0x1d6   :  { %v231_v27 = vsel %vm228_vm15, %v230_v25, %v226_v26 }
 0x1d7   :  { %v232_v28 = vmul.f32 %v231_v27, %v207_v5  ;;  %v239_v30 = vadd.f32 1.0, %v237_v23 }
 0x1d9   :  { %v362_v29 = vclamps-f32 %v232_v28, 1.0  ;;  %v241_v35 = vpack.c.bf16 %v239_v30, %v239_v30 }
 0x1db   :  { %v236_v33 = vpack.c.bf16 %v362_v29, %v362_v29  ;;  %v245_v40 = vunpack.c.l.bf16 %v241_v35 }
 0x1dd   :  { %v238_v34 = vunpack.c.l.bf16 %v236_v33  ;;  %v247_v43 = vmul.f32 %v245_v40, %v243_v17 }
 0x1df   :  { %v240_v38 = vadd.f32 1.0, %v238_v34 }
 0x1e1   :  { %v242_v39 = vpack.c.bf16 %v240_v38, %v240_v38 }
 0x1e3   :  { %v246_v42 = vunpack.c.l.bf16 %v242_v39 }
 0x1e5   :  { %v248_v44 = vmul.f32 %v246_v42, %v244_v41 }
 0x1e7   :  { %v249_v45 = vpack.c.bf16 %v248_v44, %v247_v43 }
 0x1e9   :  { %326 = vmatmul.bf16.vlgmr.msra.gmra.mxu1 %v249_v45 }
 0x266   :  { %v327_v8 = vpop.f32.mrf.mxu1 }
 0x267   :  { %v328_v46 = vadd.f32 %v411_v63, %v327_v8 }
 0x269   :  { %332 = vst.msk [vmem:[#allocation2] sm:$0xff] %vm30_vm0, %v328_v46 }
 0x26e   :  { %v329_v47 = vpop.f32.mrf.mxu1 }
 0x26f   :  { %v330_v48 = vadd.f32 %v411_v63, %v329_v47 }
 0x271   :  { %333 = vst.msk [vmem:[#allocation2 + $0x8] sm:$0xff] %vm30_vm0, %v330_v48 }
 0x272   :  { %346 = dma.vmem_to_hbm [thread:$0]  %s339_s0, 256, %s341_s30, [#allocation3], %s450_s3, %s450_s3, %s451_s8  }
 0x273   :  { %446 = dma.done.wait [#allocation3], 256  }
 0x274   :  { %447 = vsyncadd [#allocation3], 4294967040 }
 0x275   :  { %351 = vsyncpa [#allocation3], 1 }

</bundles_post_ra>
